<compile_context>
chip_gen: v6e
topology: v6e:2x2x1
jax: 0.10.0
libtpu: 0.0.40
codegen_flags: <defaults>
</compile_context>

<pallas_src>
import functools

import jax
import jax.numpy as jnp
from jax.experimental import pallas as pl
from jax.experimental.pallas import tpu as pltpu


def _make_actor_kernel(n_linear):
    """Builds a fused Actor kernel for `n_linear` Linear layers."""

    def kernel(x_ref, *args):
        # args layout: w1, b1, ..., wL, bL, scale_ref, bias_ref, out_ref
        param_refs = args[: 2 * n_linear]
        scale_ref, bias_ref, out_ref = args[2 * n_linear:]

        h = x_ref[...]
        for i in range(n_linear):
            w = param_refs[2 * i][...]
            b = param_refs[2 * i + 1][...]
            h = jnp.dot(h, w, preferred_element_type=jnp.float32) + b
            if i < n_linear - 1:           # ReLU between hidden layers only
                h = jnp.maximum(h, 0.0)

        # tanh -> EUP; scale/bias -> VPU; single lane-dense store.
        out_ref[...] = jnp.tanh(h) * scale_ref[...] + bias_ref[...]

    return kernel


def actor_forward(x, params, action_scale, action_bias, *, block_batch=None):
    """Fused Pallas forward pass of the Actor.

    x:      (batch, obs_size) f32
    params: list of (W, b) with W: (in, out), b: (1, out)   [torch Linear, transposed]
    action_scale / action_bias: python floats or (action_size,) arrays
    """
    batch, obs_size = x.shape
    n_linear = len(params)
    action_size = params[-1][0].shape[1]

    # --- batch tiling -------------------------------------------------------
    if block_batch is None:
        block_batch = min(batch, 1024)      # large tiles amortize per-step overhead
    padded = pl.cdiv(batch, block_batch) * block_batch
    if padded != batch:
        x = jnp.pad(x, ((0, padded - batch), (0, 0)))
    grid = (padded // block_batch,)

    # --- flat parameter list ------------------------------------------------
    scale2d = jnp.broadcast_to(
        jnp.asarray(action_scale, jnp.float32).reshape(1, -1), (1, action_size))
    bias2d = jnp.broadcast_to(
        jnp.asarray(action_bias, jnp.float32).reshape(1, -1), (1, action_size))

    flat_params = []
    for (w, b) in params:
        flat_params.append(w)
        flat_params.append(b)
    flat_params.append(scale2d)
    flat_params.append(bias2d)

    # --- specs --------------------------------------------------------------
    x_spec = pl.BlockSpec((block_batch, obs_size), lambda i: (i, 0))
    const_specs = [pl.BlockSpec(p.shape, lambda i: (0, 0)) for p in flat_params]
    out_spec = pl.BlockSpec((block_batch, action_size), lambda i: (i, 0))

    # --- cost estimate ------------------------------------------------------
    flops = 0
    param_bytes = 0
    for (w, b) in params:
        fan_in, fan_out = w.shape
        flops += 2 * padded * fan_in * fan_out
        param_bytes += (w.size + b.size) * 4
    bytes_accessed = param_bytes + (x.size + padded * action_size + 2 * action_size) * 4
    cost = pl.CostEstimate(
        flops=flops,
        transcendentals=padded * action_size,   # tanh
        bytes_accessed=bytes_accessed,
    )

    kernel = _make_actor_kernel(n_linear)

    out = pl.pallas_call(
        kernel,
        out_shape=jax.ShapeDtypeStruct((padded, action_size), jnp.float32),
        grid=grid,
        in_specs=[x_spec] + const_specs,
        out_specs=out_spec,
        compiler_params=pltpu.CompilerParams(
            dimension_semantics=("parallel",)),
        cost_estimate=cost,
    )(x, *flat_params)

    return out[:batch]


def make_params(key, obs_size, action_size, num_layers, num_units):
    """Deterministic synthetic parameters matching the torch MLP's shapes."""
    sizes = [obs_size] + [num_units] * num_layers + [action_size]
    layers = []
    for (fan_in, fan_out) in zip(sizes[:-1], sizes[1:]):
        key, kw, kb = jax.random.split(key, 3)
        bound = 1.0 / jnp.sqrt(fan_in)
        w = jax.random.uniform(kw, (fan_in, fan_out), jnp.float32, -bound, bound)
        b = jax.random.uniform(kb, (1, fan_out), jnp.float32, -bound, bound)
        layers.append((w, b))
    return layers


def actor_reference(x, params, action_scale, action_bias):
    """Pure-JAX reference of the torch forward pass."""
    h = x
    for i, (w, b) in enumerate(params):
        h = h @ w + b
        if i < len(params) - 1:
            h = jnp.maximum(h, 0.0)
    return jnp.tanh(h) * action_scale + action_bias


if __name__ == "__main__":
    obs_size, action_size = 16, 8
    num_layers, num_units = 2, 32
    batch = 8
    action_low, action_high = -1.0, 2.0
    action_scale = (action_high - action_low) / 2.0   # 1.5
    action_bias = (action_high + action_low) / 2.0    # 0.5

    key = jax.random.PRNGKey(0)
    kx, kp = jax.random.split(key, 2)
    x = jax.random.normal(kx, (batch, obs_size), jnp.float32)
    params = make_params(kp, obs_size, action_size, num_layers, num_units)

    fwd = jax.jit(functools.partial(actor_forward,
                                    action_scale=action_scale,
                                    action_bias=action_bias))
    act = fwd(x, params)
    act = jax.block_until_ready(act)

    ref = actor_reference(x, params, action_scale, action_bias)
    assert act.shape == (batch, action_size)
    assert jnp.allclose(act, ref, atol=1e-5, rtol=1e-5), (
        float(jnp.max(jnp.abs(act - ref))))

    print("KERNEL_OK")
</pallas_src>

<mosaic_0001>
module attributes {stable_mosaic.version = 11 : i64} {
  func.func @kernel(%arg0: i32, %arg1: memref<8x16xf32, #tpu.memory_space<vmem>>, %arg2: memref<16x32xf32, #tpu.memory_space<vmem>>, %arg3: memref<1x32xf32, #tpu.memory_space<vmem>>, %arg4: memref<32x32xf32, #tpu.memory_space<vmem>>, %arg5: memref<1x32xf32, #tpu.memory_space<vmem>>, %arg6: memref<32x8xf32, #tpu.memory_space<vmem>>, %arg7: memref<1x8xf32, #tpu.memory_space<vmem>>, %arg8: memref<1x8xf32, #tpu.memory_space<vmem>>, %arg9: memref<1x8xf32, #tpu.memory_space<vmem>>, %arg10: memref<8x8xf32, #tpu.memory_space<vmem>>) attributes {dimension_semantics = [#tpu.dimension_semantics<parallel>], iteration_bounds = array<i64: 1>, scalar_prefetch = 0 : i64, scratch_operands = 0 : i64, tpu.core_type = #tpu.core_type<tc>, window_params = [{transform_indices = @transform_0, window_bounds = array<i64: 8, 16>}, {pipeline_mode = #tpu.pipeline_mode<synchronous>, transform_indices = @transform_1, window_bounds = array<i64: 16, 32>}, {pipeline_mode = #tpu.pipeline_mode<synchronous>, transform_indices = @transform_2, window_bounds = array<i64: 1, 32>}, {pipeline_mode = #tpu.pipeline_mode<synchronous>, transform_indices = @transform_3, window_bounds = array<i64: 32, 32>}, {pipeline_mode = #tpu.pipeline_mode<synchronous>, transform_indices = @transform_4, window_bounds = array<i64: 1, 32>}, {pipeline_mode = #tpu.pipeline_mode<synchronous>, transform_indices = @transform_5, window_bounds = array<i64: 32, 8>}, {pipeline_mode = #tpu.pipeline_mode<synchronous>, transform_indices = @transform_6, window_bounds = array<i64: 1, 8>}, {pipeline_mode = #tpu.pipeline_mode<synchronous>, transform_indices = @transform_7, window_bounds = array<i64: 1, 8>}, {pipeline_mode = #tpu.pipeline_mode<synchronous>, transform_indices = @transform_8, window_bounds = array<i64: 1, 8>}, {transform_indices = @transform_9, window_bounds = array<i64: 8, 8>}]} {
    %c0 = arith.constant 0 : index
    %c0_0 = arith.constant 0 : index
    %0 = vector.load %arg1[%c0, %c0_0] : memref<8x16xf32, #tpu.memory_space<vmem>>, vector<8x16xf32>
    %c0_1 = arith.constant 0 : index
    %c0_2 = arith.constant 0 : index
    %1 = vector.load %arg2[%c0_1, %c0_2] : memref<16x32xf32, #tpu.memory_space<vmem>>, vector<16x32xf32>
    %c0_3 = arith.constant 0 : index
    %c0_4 = arith.constant 0 : index
    %2 = vector.load %arg3[%c0_3, %c0_4] : memref<1x32xf32, #tpu.memory_space<vmem>>, vector<1x32xf32>
    %cst = arith.constant dense<0.000000e+00> : vector<8x32xf32>
    %3 = tpu.matmul %0, %1, %cst {dimension_numbers = #tpu.dot_dimension_numbers<[1], [0], [0], [1], [0, 0, 1, 1], [], []>} : vector<8x16xf32>, vector<16x32xf32>, vector<8x32xf32> -> vector<8x32xf32>
    %4 = vector.broadcast %2 : vector<1x32xf32> to vector<8x32xf32>
    %5 = arith.addf %3, %4 : vector<8x32xf32>
    %cst_5 = arith.constant 0.000000e+00 : f32
    %6 = vector.broadcast %cst_5 : f32 to vector<8x32xf32>
    %7 = arith.maximumf %5, %6 : vector<8x32xf32>
    %c0_6 = arith.constant 0 : index
    %c0_7 = arith.constant 0 : index
    %8 = vector.load %arg4[%c0_6, %c0_7] : memref<32x32xf32, #tpu.memory_space<vmem>>, vector<32x32xf32>
    %c0_8 = arith.constant 0 : index
    %c0_9 = arith.constant 0 : index
    %9 = vector.load %arg5[%c0_8, %c0_9] : memref<1x32xf32, #tpu.memory_space<vmem>>, vector<1x32xf32>
    %cst_10 = arith.constant dense<0.000000e+00> : vector<8x32xf32>
    %10 = tpu.matmul %7, %8, %cst_10 {dimension_numbers = #tpu.dot_dimension_numbers<[1], [0], [0], [1], [0, 0, 1, 1], [], []>} : vector<8x32xf32>, vector<32x32xf32>, vector<8x32xf32> -> vector<8x32xf32>
    %11 = vector.broadcast %9 : vector<1x32xf32> to vector<8x32xf32>
    %12 = arith.addf %10, %11 : vector<8x32xf32>
    %cst_11 = arith.constant 0.000000e+00 : f32
    %13 = vector.broadcast %cst_11 : f32 to vector<8x32xf32>
    %14 = arith.maximumf %12, %13 : vector<8x32xf32>
    %c0_12 = arith.constant 0 : index
    %c0_13 = arith.constant 0 : index
    %15 = vector.load %arg6[%c0_12, %c0_13] : memref<32x8xf32, #tpu.memory_space<vmem>>, vector<32x8xf32>
    %c0_14 = arith.constant 0 : index
    %c0_15 = arith.constant 0 : index
    %16 = vector.load %arg7[%c0_14, %c0_15] : memref<1x8xf32, #tpu.memory_space<vmem>>, vector<1x8xf32>
    %cst_16 = arith.constant dense<0.000000e+00> : vector<8x8xf32>
    %17 = tpu.matmul %14, %15, %cst_16 {dimension_numbers = #tpu.dot_dimension_numbers<[1], [0], [0], [1], [0, 0, 1, 1], [], []>} : vector<8x32xf32>, vector<32x8xf32>, vector<8x8xf32> -> vector<8x8xf32>
    %18 = vector.broadcast %16 : vector<1x8xf32> to vector<8x8xf32>
    %19 = arith.addf %17, %18 : vector<8x8xf32>
    %20 = math.tanh %19 : vector<8x8xf32>
    %c0_17 = arith.constant 0 : index
    %c0_18 = arith.constant 0 : index
    %21 = vector.load %arg8[%c0_17, %c0_18] : memref<1x8xf32, #tpu.memory_space<vmem>>, vector<1x8xf32>
    %22 = vector.broadcast %21 : vector<1x8xf32> to vector<8x8xf32>
    %23 = arith.mulf %20, %22 : vector<8x8xf32>
    %c0_19 = arith.constant 0 : index
    %c0_20 = arith.constant 0 : index
    %24 = vector.load %arg9[%c0_19, %c0_20] : memref<1x8xf32, #tpu.memory_space<vmem>>, vector<1x8xf32>
    %25 = vector.broadcast %24 : vector<1x8xf32> to vector<8x8xf32>
    %26 = arith.addf %23, %25 : vector<8x8xf32>
    %c0_21 = arith.constant 0 : index
    %c0_22 = arith.constant 0 : index
    %27 = vector.load %arg10[%c0_21, %c0_22] : memref<8x8xf32, #tpu.memory_space<vmem>>, vector<8x8xf32>
    tpu.vector_store %arg10[%c0_21, %c0_22], %26 {strides = array<i32>} : memref<8x8xf32, #tpu.memory_space<vmem>>, vector<8x8xf32>,
    return
  }
  func.func @transform_0(%arg0: i32) -> (i32, i32) {
    %c0_i32 = arith.constant 0 : i32
    %c0_i32_0 = arith.constant 0 : i32
    return %arg0, %c0_i32 : i32, i32
  }
  func.func @transform_1(%arg0: i32) -> (i32, i32) {
    %c0_i32 = arith.constant 0 : i32
    %c0_i32_0 = arith.constant 0 : i32
    %c0_i32_1 = arith.constant 0 : i32
    return %c0_i32, %c0_i32_0 : i32, i32
  }
  func.func @transform_2(%arg0: i32) -> (i32, i32) {
    %c0_i32 = arith.constant 0 : i32
    %c0_i32_0 = arith.constant 0 : i32
    %c0_i32_1 = arith.constant 0 : i32
    return %c0_i32, %c0_i32_0 : i32, i32
  }
  func.func @transform_3(%arg0: i32) -> (i32, i32) {
    %c0_i32 = arith.constant 0 : i32
    %c0_i32_0 = arith.constant 0 : i32
    %c0_i32_1 = arith.constant 0 : i32
    return %c0_i32, %c0_i32_0 : i32, i32
  }
  func.func @transform_4(%arg0: i32) -> (i32, i32) {
    %c0_i32 = arith.constant 0 : i32
    %c0_i32_0 = arith.constant 0 : i32
    %c0_i32_1 = arith.constant 0 : i32
    return %c0_i32, %c0_i32_0 : i32, i32
  }
  func.func @transform_5(%arg0: i32) -> (i32, i32) {
    %c0_i32 = arith.constant 0 : i32
    %c0_i32_0 = arith.constant 0 : i32
    %c0_i32_1 = arith.constant 0 : i32
    return %c0_i32, %c0_i32_0 : i32, i32
  }
  func.func @transform_6(%arg0: i32) -> (i32, i32) {
    %c0_i32 = arith.constant 0 : i32
    %c0_i32_0 = arith.constant 0 : i32
    %c0_i32_1 = arith.constant 0 : i32
    return %c0_i32, %c0_i32_0 : i32, i32
  }
  func.func @transform_7(%arg0: i32) -> (i32, i32) {
    %c0_i32 = arith.constant 0 : i32
    %c0_i32_0 = arith.constant 0 : i32
    %c0_i32_1 = arith.constant 0 : i32
    return %c0_i32, %c0_i32_0 : i32, i32
  }
  func.func @transform_8(%arg0: i32) -> (i32, i32) {
    %c0_i32 = arith.constant 0 : i32
    %c0_i32_0 = arith.constant 0 : i32
    %c0_i32_1 = arith.constant 0 : i32
    return %c0_i32, %c0_i32_0 : i32, i32
  }
  func.func @transform_9(%arg0: i32) -> (i32, i32) {
    %c0_i32 = arith.constant 0 : i32
    %c0_i32_0 = arith.constant 0 : i32
    return %arg0, %c0_i32 : i32, i32
  }
}

</mosaic_0001>

<bundles_post_ra>
// kernel: actor_forward.1
= control target key start
LH: loop header
LB: loop body
LE: loop exit
PB: predicated region body
PF: predicated region fallthrough
CT: control target
= control target key end

     0   :  { %14 = vsyncpa [#allocation3], 0  ;;  %s544_s0 = inlined_call_operand.hbm [shape: f32[8,16], index: 0, kind: input, shape index: {}]   ;;  %s545_s1 = inlined_call_operand.vmem [shape: f32[16,32], index: 1, kind: input, shape index: {}]   ;;  %s546_s2 = inlined_call_operand.vmem [shape: f32[1,32], index: 2, kind: input, shape index: {}]   ;;  %s547_s3 = inlined_call_operand.vmem [shape: f32[32,32], index: 3, kind: input, shape index: {}]   ;;  %s548_s4 = inlined_call_operand.vmem [shape: f32[1,32], index: 4, kind: input, shape index: {}]   ;;  %s549_s5 = inlined_call_operand.vmem [shape: f32[32,8], index: 5, kind: input, shape index: {}]   ;;  %s550_s6 = inlined_call_operand.vmem [shape: f32[1,8], index: 6, kind: input, shape index: {}]   ;;  %s551_s7 = inlined_call_operand.vmem [shape: f32[1,8], index: 7, kind: input, shape index: {}]   ;;  %s552_s8 = inlined_call_operand.vmem [shape: f32[1,8], index: 8, kind: input, shape index: {}]   ;;  %s553_s9 = inlined_call_operand.hbm [shape: f32[8,8], index: 9, kind: output, shape index: {}]  }
   0x1   :  { %15 = vsyncpa [#allocation4], 0  ;;  %s434_s30 = smov [#allocation2]  }
   0x2   :  { %s22_s10 = sshll.u32 %s434_s30, 4  ;;  %s23_s10 = int_to_ptr.vmem [resolvable:$true] %s22_s10 }
   0x3   :  { %s398_s11 = scalar_lea.vmem %s23_s10, 128  ;;  %p403_p1 = scmp.lt.s32.totalorder %s23_s10, %s23_s10 }
   0x4   :  { %p399_p0 = scmp.ne.s32.totalorder %s23_s10, %s398_s11  ;;  %p404_p2 = scmp.lt.s32.totalorder %s398_s11, %s398_s11 }
   0x6   :  { %p405_p3 = por %p404_p2, %p403_p1 }
   0x8   :  { %p406_p4 = pnand %p405_p3, %p399_p0 }
   0xa   :  { %409 = shalt.err (!%p406_p4)
}
   0xb   :  { %25 = dma.hbm_to_vmem [thread:$0]  %s544_s0, 128, %s23_s10, [#allocation3]  }
   0xc   :  { %430 = dma.done.wait [#allocation3], 128  }
   0xd   :  { %431 = vsyncadd [#allocation3], 4294967168  ;;  %v435_v0 = vmov 0.0   ;;  %vm436_vm0 = vmmov 0   ;;  %v47_v1 = vld [vmem:[%s545_s1 + $0x8] sm:$0xff]  ;;  %v46_v2 = vld [vmem:[%s545_s1] sm:$0xff] }
   0xe   :  { %355 = vmatprep.subr.mxu0 %v435_v0  ;;  %359 = vmatprep.mubr.msk.f32.mxu0 %vm436_vm0, %v435_v0  ;;  %v45_v3 = vld [vmem:[#allocation2] sm:$0xff]  ;;  %vm55_vm1 = vcmask 130048   ;;  %v133_v4 = vld [vmem:[%s547_s3 + $0x18] sm:$0xff]  ;;  %v132_v5 = vld [vmem:[%s547_s3 + $0x10] sm:$0xff]  ;;  %vm141_vm2 = vcmask 261120   ;;  %s437_s17 = smov [#allocation5]  }
   0xf   :  { %362 = vmatprep.subr.mxu1 %v435_v0  ;;  %370 = vmatprep.mubr.msk.f32.mxu1 %vm436_vm0, %v435_v0  ;;  %v131_v6 = vld [vmem:[%s547_s3 + $0x8] sm:$0xff]  ;;  %v130_v7 = vld [vmem:[%s547_s3] sm:$0xff]  ;;  %v219_v8 = vld [vmem:[%s549_s5 + $0x18] sm:$0xff]  ;;  %s325_s0 = sshll.u32 %s437_s17, 4  ;;  %vm317_vm3 = vcmask 64512   ;;  %s326_s0 = int_to_ptr.vmem [resolvable:$true] %s325_s0 }
  0x10   :  { %356 = vmatpush3.msra.mxu0 %v47_v1  ;;  %363 = vmatpush3.msra.mxu1 %v133_v4  ;;  %v334_v9 = vld [vmem:[%s546_s2] ss:$0 sm:$0xff]  ;;  %v218_v14 = vld [vmem:[%s549_s5 + $0x10] sm:$0xff]  ;;  %v217_v15 = vld [vmem:[%s549_s5 + $0x8] sm:$0xff]  ;;  %p415_p6 = scmp.lt.s32.totalorder %s326_s0, %s326_s0 }
  0x11   :  { %357 = vmatprep.subr.mxu0 %v435_v0  ;;  %364 = vmatprep.subr.mxu1 %v435_v0  ;;  %v216_v16 = vld [vmem:[%s549_s5] sm:$0xff] }
  0x12   :  { %358 = vmatpush3.msra.mxu0 %v46_v2  ;;  %365 = vmatpush3.msra.mxu1 %v132_v5  ;;  %v336_v17 = vld [vmem:[%s548_s4] ss:$0 sm:$0xff] }
  0x13   :  { %360 = vmatmul.mubr.msk.f32.vlgmr.msra.gmra.mxu0 %vm55_vm1, %v45_v3  ;;  %373 = vmatprep.subr.mxu0 %v435_v0  ;;  %v338_v22 = vld [vmem:[%s550_s6] ss:$0 sm:$0xff]  ;;  %s410_s6 = scalar_lea.vmem %s326_s0, 128 }
  0x14   :  { %381 = vmatprep.mubr.msk.f32.mxu0 %vm436_vm0, %v435_v0  ;;  %366 = vmatprep.subr.mxu1 %v435_v0  ;;  %v340_v26 = vld [vmem:[%s551_s7] ss:$0 sm:$0xff]  ;;  %p411_p5 = scmp.ne.s32.totalorder %s326_s0, %s410_s6  ;;  %p416_p7 = scmp.lt.s32.totalorder %s410_s6, %s410_s6 }
  0x15   :  { %367 = vmatpush3.msra.mxu1 %v131_v6  ;;  %374 = vmatpush3.msra.mxu0 %v219_v8  ;;  %v341_v28 = vld [vmem:[%s552_s8] ss:$0 sm:$0xff] }
  0x16   :  { %368 = vmatprep.subr.mxu1 %v435_v0  ;;  %375 = vmatprep.subr.mxu0 %v435_v0  ;;  %p417_p8 = por %p416_p7, %p415_p6 }
  0x17   :  { %369 = vmatpush3.msra.mxu1 %v130_v7  ;;  %376 = vmatpush3.msra.mxu0 %v218_v14 }
  0x18   :  { %377 = vmatprep.subr.mxu0 %v435_v0  ;;  %p418_p9 = pnand %p417_p8, %p411_p5 }
  0x19   :  { %378 = vmatpush3.msra.mxu0 %v217_v15 }
  0x1a   :  { %379 = vmatprep.subr.mxu0 %v435_v0 }
  0x1b   :  { %380 = vmatpush3.msra.mxu0 %v216_v16 }
  0xd3   :  { %v125_v10 = vpop.f32.mrf.mxu0 }
  0xd4   :  { %v126_v11 = vadd.f32 %v334_v9, %v125_v10 }
  0xd5   :  { %v361_v12 = vpop.f32.mrf.mxu0 }
  0xd6   :  { %v129_v13 = vmax.f32 %v126_v11, 0.0 }
  0xd8   :  { %371 = vmatmul.mubr.msk.f32.vlgmr.msra.gmra.mxu1 %vm141_vm2, %v129_v13 }
 0x198   :  { %v211_v18 = vpop.f32.mrf.mxu1 }
 0x199   :  { %v212_v19 = vadd.f32 %v336_v17, %v211_v18 }
 0x19a   :  { %v372_v20 = vpop.f32.mrf.mxu1 }
 0x19b   :  { %v215_v21 = vmax.f32 %v212_v19, 0.0 }
 0x19d   :  { %382 = vmatmul.mubr.msk.f32.vlgmr.msra.gmra.mxu0 %vm141_vm2, %v215_v21 }
 0x25d   :  { %v296_v23 = vpop.f32.mrf.mxu0 }
 0x25e   :  { %v297_v24 = vadd.f32 %v338_v22, %v296_v23 }
 0x25f   :  { %v383_v25 = vpop.f32.mrf.mxu0 }
 0x260   :  { %388 = vtanh.f32 %v297_v24 }
 0x26d   :  { %v389_v27 = vpop.eup %388 }
 0x26e   :  { %v308_v29 = vmul.f32 %v389_v27, %v340_v26 }
 0x270   :  { %v316_v30 = vadd.f32 %v341_v28, %v308_v29 }
 0x272   :  { %318 = vst.msk [vmem:[#allocation5] sm:$0xff] %vm317_vm3, %v316_v30 }
 0x273   :  { %421 = shalt.err (!%p418_p9)
}
 0x274   :  { %328 = dma.vmem_to_hbm [thread:$0]  %s326_s0, 128, %s553_s9, [#allocation4]  }
 0x275   :  { %432 = dma.done.wait [#allocation4], 128  }
 0x276   :  { %433 = vsyncadd [#allocation4], 4294967168 }
 0x277   :  { %332 = vsyncpa [#allocation3], 1 }
 0x278   :  { %333 = vsyncpa [#allocation4], 1 }

</bundles_post_ra>
